<compile_context>
chip_gen: v7x
topology: tpu7x:2x2x1
jax: 0.10.0
libtpu: 0.0.40
codegen_flags: <defaults>
</compile_context>

<pallas_src>
import jax
import jax.numpy as jnp
from jax.experimental import pallas as pl
from jax.experimental.pallas import tpu as pltpu


def _dqn_kernel(x_ref, w1_ref, b1_ref, w2_ref, b2_ref, w3_ref, b3_ref, o_ref):
    # x_ref: [TB, K] batch-major tile straight from HBM (no wrapper transpose).
    # Activations are kept transposed ([features, TB]) so the batch lives on
    # the 128-lane axis and the output is a lane-dense [1, TB] slab.

    # ---- fc1 + ReLU on the MXU: h1[h, b] = sum_k W1[h, k] * x[b, k].
    #      Contraction over the minor dim of both operands (q @ k^T pattern);
    #      Mosaic pads/masks the K=6 contraction dim.
    h1 = jax.lax.dot_general(
        w1_ref[...], x_ref[...],
        dimension_numbers=(((1,), (1,)), ((), ())),
        preferred_element_type=jnp.float32)                    # [H, TB]
    h1 = jnp.maximum(h1 + b1_ref[...], 0.0)

    # ---- fc2 + ReLU: single MXU matmul, bf16 weights/activations, f32 accum.
    h2 = jnp.dot(w2_ref[...], h1.astype(w2_ref.dtype),
                 preferred_element_type=jnp.float32)            # [H, TB]
    h2 = jnp.maximum(h2 + b2_ref[...], 0.0)

    # ---- head (out_features = 1): VPU multiply + XLU sublane reduce.
    out = jnp.sum(h2 * w3_ref[...], axis=0, keepdims=True) + b3_ref[0]  # [1, TB]
    o_ref[...] = out.astype(o_ref.dtype)


def _round_up(n, m):
    return ((n + m - 1) // m) * m


def dqn_regressor_forward(x, params, *, block_b=2048):
    """Fused forward pass. x: [B, input_size] f32 -> [B, 1] f32.

    params = (w1 [H,K], b1 [H,1], w2 [H,H], b2 [H,1], w3 [H,1], b3 [1]).
    """
    w1, b1, w2, b2, w3, b3 = params
    B, K = x.shape
    H = w1.shape[0]

    LANE = 128
    block_b = max(LANE, (int(block_b) // LANE) * LANE)   # keep a 128-multiple

    # Batch tile: lane-aligned and large (amortize per-grid-step overhead),
    # but always >= 2 blocks when B >= 256 so v7x can shard the "parallel"
    # grid axis across both TensorCores.
    if B >= 2 * LANE:
        tb_two_blocks = _round_up(_round_up(B, 2) // 2, LANE)
        TB = min(block_b, tb_two_blocks)
    else:
        TB = min(block_b, _round_up(B, LANE))
    TB = max(TB, LANE)
    n_blocks = pl.cdiv(B, TB)
    Bp = n_blocks * TB                    # padded output width (lane-dense)

    # Single-pass MXU for fc2 on all generations (f32 accumulation in-kernel).
    w2_bf16 = w2.astype(jnp.bfloat16)

    flops = 2 * Bp * (K * H + H * H + H)
    bytes_accessed = (4 * B * K + 4 * Bp + 4 * H * K + 4 * H
                      + 2 * H * H + 4 * H + 4 * H + 4)

    ot = pl.pallas_call(
        _dqn_kernel,
        out_shape=jax.ShapeDtypeStruct((1, Bp), jnp.float32),
        grid=(n_blocks,),
        in_specs=[
            pl.BlockSpec((TB, K), lambda i: (i, 0)),            # x, native layout
            pl.BlockSpec((H, K), lambda i: (0, 0)),             # W1 (resident)
            pl.BlockSpec((H, 1), lambda i: (0, 0)),             # b1
            pl.BlockSpec((H, H), lambda i: (0, 0)),             # W2 bf16 (resident)
            pl.BlockSpec((H, 1), lambda i: (0, 0)),             # b2
            pl.BlockSpec((H, 1), lambda i: (0, 0)),             # head weight column
            pl.BlockSpec(memory_space=pltpu.MemorySpace.SMEM),  # b3 scalar
        ],
        out_specs=pl.BlockSpec((1, TB), lambda i: (0, i)),
        compiler_params=pltpu.CompilerParams(
            dimension_semantics=("parallel",),
            vmem_limit_bytes=32 * 1024 * 1024),
        cost_estimate=pl.CostEstimate(
            flops=flops, transcendentals=0, bytes_accessed=bytes_accessed),
    )(x, w1, b1, w2_bf16, b2, w3, b3)

    # Ragged last block: lanes >= B hold garbage (OOB reads) and are sliced off.
    return ot[0, :B].reshape(B, 1)


def init_params(key, input_size, hidden=128):
    """Mirror torch.nn.Linear default init: U(-1/sqrt(fan_in), 1/sqrt(fan_in))."""
    def linear(key, fan_in, fan_out):
        kw, kb = jax.random.split(key)
        bound = 1.0 / jnp.sqrt(float(fan_in))
        w = jax.random.uniform(kw, (fan_out, fan_in), jnp.float32, -bound, bound)
        b = jax.random.uniform(kb, (fan_out,), jnp.float32, -bound, bound)
        return w, b

    k1, k2, k3 = jax.random.split(key, 3)
    w1, b1 = linear(k1, input_size, hidden)    # [H, K], [H]
    w2, b2 = linear(k2, hidden, hidden)        # [H, H], [H]
    w3, b3 = linear(k3, hidden, 1)             # [1, H], [1]
    return (w1, b1.reshape(hidden, 1),
            w2, b2.reshape(hidden, 1),
            w3.T,                              # [H, 1] head weight column
            b3)                                # (1,)   scalar bias (SMEM)


def _reference(x, params):
    """Plain-JAX f32 reference (full-precision matmuls)."""
    w1, b1, w2, b2, w3, b3 = params
    hp = jax.lax.Precision.HIGHEST
    h1 = jnp.maximum(jnp.dot(x, w1.T, precision=hp) + b1[:, 0], 0.0)
    h2 = jnp.maximum(jnp.dot(h1, w2.T, precision=hp) + b2[:, 0], 0.0)
    return jnp.dot(h2, w3, precision=hp) + b3


if __name__ == "__main__":
    key = jax.random.PRNGKey(0)
    kx, kp = jax.random.split(key)

    INPUT_SIZE = 6   # Acrobot-v1 observation dimension
    params = init_params(kp, INPUT_SIZE)

    # Tolerance accommodates bf16 W2 / bf16 h1 on the MXU (f32 accumulation)
    # vs. the HIGHEST-precision f32 reference.
    ATOL = RTOL = 1e-2

    # Small batch: single lane-aligned block (grid of 1), TB rounded up to 128.
    x_small = jax.random.normal(kx, (8, INPUT_SIZE), jnp.float32)
    out_small = jax.block_until_ready(dqn_regressor_forward(x_small, params))
    ref_small = _reference(x_small, params)
    assert out_small.shape == (8, 1)
    assert jnp.allclose(out_small, ref_small, atol=ATOL, rtol=RTOL)

    # Larger batch: exercises the >=2-block parallel grid (v7x megacore path)
    # and the ragged, un-padded last block.
    x_big = jax.random.normal(jax.random.fold_in(kx, 1), (300, INPUT_SIZE),
                              jnp.float32)
    out_big = jax.block_until_ready(dqn_regressor_forward(x_big, params))
    ref_big = _reference(x_big, params)
    assert out_big.shape == (300, 1)
    assert jnp.allclose(out_big, ref_big, atol=ATOL, rtol=RTOL)

    print("KERNEL_OK")
</pallas_src>

<mosaic_0001>
module attributes {stable_mosaic.version = 11 : i64} {
  func.func @_dqn_kernel(%arg0: i32, %arg1: memref<128x6xf32, #tpu.memory_space<vmem>>, %arg2: memref<128x6xf32, #tpu.memory_space<vmem>>, %arg3: memref<128x1xf32, #tpu.memory_space<vmem>>, %arg4: memref<128x128xbf16, #tpu.memory_space<vmem>>, %arg5: memref<128x1xf32, #tpu.memory_space<vmem>>, %arg6: memref<128x1xf32, #tpu.memory_space<vmem>>, %arg7: memref<1xf32, #tpu.memory_space<smem>>, %arg8: memref<1x128xf32, #tpu.memory_space<vmem>>) attributes {dimension_semantics = [#tpu.dimension_semantics<parallel>], iteration_bounds = array<i64: 1>, scalar_prefetch = 0 : i64, scratch_operands = 0 : i64, tpu.core_type = #tpu.core_type<tc>, window_params = [{transform_indices = @transform_0, window_bounds = array<i64: 128, 6>}, {pipeline_mode = #tpu.pipeline_mode<synchronous>, transform_indices = @transform_1, window_bounds = array<i64: 128, 6>}, {pipeline_mode = #tpu.pipeline_mode<synchronous>, transform_indices = @transform_2, window_bounds = array<i64: 128, 1>}, {pipeline_mode = #tpu.pipeline_mode<synchronous>, transform_indices = @transform_3, window_bounds = array<i64: 128, 128>}, {pipeline_mode = #tpu.pipeline_mode<synchronous>, transform_indices = @transform_4, window_bounds = array<i64: 128, 1>}, {pipeline_mode = #tpu.pipeline_mode<synchronous>, transform_indices = @transform_5, window_bounds = array<i64: 128, 1>}, {transform_indices = @transform_6, window_bounds = array<i64: 1>}, {transform_indices = @transform_7, window_bounds = array<i64: 1, 128>}]} {
    %c0 = arith.constant 0 : index
    %c0_0 = arith.constant 0 : index
    %0 = vector.load %arg2[%c0, %c0_0] : memref<128x6xf32, #tpu.memory_space<vmem>>, vector<128x6xf32>
    %c0_1 = arith.constant 0 : index
    %c0_2 = arith.constant 0 : index
    %1 = vector.load %arg1[%c0_1, %c0_2] : memref<128x6xf32, #tpu.memory_space<vmem>>, vector<128x6xf32>
    %cst = arith.constant dense<0.000000e+00> : vector<128x128xf32>
    %2 = tpu.matmul %0, %1, %cst {dimension_numbers = #tpu.dot_dimension_numbers<[1], [1], [0], [0], [0, 0, 1, 0], [], []>} : vector<128x6xf32>, vector<128x6xf32>, vector<128x128xf32> -> vector<128x128xf32>
    %c0_3 = arith.constant 0 : index
    %c0_4 = arith.constant 0 : index
    %3 = vector.load %arg3[%c0_3, %c0_4] : memref<128x1xf32, #tpu.memory_space<vmem>>, vector<128x1xf32>
    %4 = vector.broadcast %3 : vector<128x1xf32> to vector<128x128xf32>
    %5 = arith.addf %2, %4 : vector<128x128xf32>
    %cst_5 = arith.constant 0.000000e+00 : f32
    %6 = vector.broadcast %cst_5 : f32 to vector<128x128xf32>
    %7 = arith.maximumf %5, %6 : vector<128x128xf32>
    %c0_6 = arith.constant 0 : index
    %c0_7 = arith.constant 0 : index
    %8 = vector.load %arg4[%c0_6, %c0_7] : memref<128x128xbf16, #tpu.memory_space<vmem>>, vector<128x128xbf16>
    %9 = arith.truncf %7 : vector<128x128xf32> to vector<128x128xbf16>
    %cst_8 = arith.constant dense<0.000000e+00> : vector<128x128xf32>
    %10 = tpu.matmul %8, %9, %cst_8 {dimension_numbers = #tpu.dot_dimension_numbers<[1], [0], [0], [1], [0, 0, 1, 1], [], []>} : vector<128x128xbf16>, vector<128x128xbf16>, vector<128x128xf32> -> vector<128x128xf32>
    %c0_9 = arith.constant 0 : index
    %c0_10 = arith.constant 0 : index
    %11 = vector.load %arg5[%c0_9, %c0_10] : memref<128x1xf32, #tpu.memory_space<vmem>>, vector<128x1xf32>
    %12 = vector.broadcast %11 : vector<128x1xf32> to vector<128x128xf32>
    %13 = arith.addf %10, %12 : vector<128x128xf32>
    %cst_11 = arith.constant 0.000000e+00 : f32
    %14 = vector.broadcast %cst_11 : f32 to vector<128x128xf32>
    %15 = arith.maximumf %13, %14 : vector<128x128xf32>
    %c0_12 = arith.constant 0 : index
    %c0_13 = arith.constant 0 : index
    %16 = vector.load %arg6[%c0_12, %c0_13] : memref<128x1xf32, #tpu.memory_space<vmem>>, vector<128x1xf32>
    %17 = vector.broadcast %16 : vector<128x1xf32> to vector<128x128xf32>
    %18 = arith.mulf %15, %17 : vector<128x128xf32>
    %cst_14 = arith.constant dense<0.000000e+00> : vector<128xf32>
    %19 = vector.multi_reduction <add>, %18, %cst_14 [0] : vector<128x128xf32> to vector<128xf32>
    %20 = vector.shape_cast %19 : vector<128xf32> to vector<1x128xf32>
    %c0_15 = arith.constant 0 : index
    %21 = memref.load %arg7[%c0_15] : memref<1xf32, #tpu.memory_space<smem>>
    %22 = vector.broadcast %21 : f32 to vector<1x128xf32>
    %23 = arith.addf %20, %22 : vector<1x128xf32>
    %c0_16 = arith.constant 0 : index
    %c0_17 = arith.constant 0 : index
    %24 = vector.load %arg8[%c0_16, %c0_17] : memref<1x128xf32, #tpu.memory_space<vmem>>, vector<1x128xf32>
    tpu.vector_store %arg8[%c0_16, %c0_17], %23 {strides = array<i32>} : memref<1x128xf32, #tpu.memory_space<vmem>>, vector<1x128xf32>,
    return
  }
  func.func @transform_0(%arg0: i32) -> (i32, i32) {
    %c0_i32 = arith.constant 0 : i32
    %c0_i32_0 = arith.constant 0 : i32
    return %arg0, %c0_i32 : i32, i32
  }
  func.func @transform_1(%arg0: i32) -> (i32, i32) {
    %c0_i32 = arith.constant 0 : i32
    %c0_i32_0 = arith.constant 0 : i32
    %c0_i32_1 = arith.constant 0 : i32
    return %c0_i32, %c0_i32_0 : i32, i32
  }
  func.func @transform_2(%arg0: i32) -> (i32, i32) {
    %c0_i32 = arith.constant 0 : i32
    %c0_i32_0 = arith.constant 0 : i32
    %c0_i32_1 = arith.constant 0 : i32
    return %c0_i32, %c0_i32_0 : i32, i32
  }
  func.func @transform_3(%arg0: i32) -> (i32, i32) {
    %c0_i32 = arith.constant 0 : i32
    %c0_i32_0 = arith.constant 0 : i32
    %c0_i32_1 = arith.constant 0 : i32
    return %c0_i32, %c0_i32_0 : i32, i32
  }
  func.func @transform_4(%arg0: i32) -> (i32, i32) {
    %c0_i32 = arith.constant 0 : i32
    %c0_i32_0 = arith.constant 0 : i32
    %c0_i32_1 = arith.constant 0 : i32
    return %c0_i32, %c0_i32_0 : i32, i32
  }
  func.func @transform_5(%arg0: i32) -> (i32, i32) {
    %c0_i32 = arith.constant 0 : i32
    %c0_i32_0 = arith.constant 0 : i32
    %c0_i32_1 = arith.constant 0 : i32
    return %c0_i32, %c0_i32_0 : i32, i32
  }
  func.func @transform_6(%arg0: i32) -> i32 {
    %c0_i32 = arith.constant 0 : i32
    %c0_i32_0 = arith.constant 0 : i32
    return %c0_i32 : i32
  }
  func.func @transform_7(%arg0: i32) -> (i32, i32) {
    %c0_i32 = arith.constant 0 : i32
    %c0_i32_0 = arith.constant 0 : i32
    return %c0_i32, %arg0 : i32, i32
  }
}

</mosaic_0001>

<bundles_post_ra>
// kernel: tpu_custom_call.1
= control target key start
LH: loop header
LB: loop body
LE: loop exit
PB: predicated region body
PF: predicated region fallthrough
CT: control target
= control target key end

     0   :  { %vm157_vm0 = vcmask 48128   ;;  %v1107_v6 = vmov 0   ;;  %s1482_s0 = inlined_call_operand.vmem [shape: f32[8,6], index: 0, kind: input, shape index: {}]   ;;  %s1483_s1 = inlined_call_operand.vmem [shape: f32[128,6], index: 1, kind: input, shape index: {}]   ;;  %s1484_s2 = inlined_call_operand.vmem [shape: f32[128,1], index: 2, kind: input, shape index: {}]   ;;  %s1485_s3 = inlined_call_operand.vmem [shape: bf16[128,128], index: 3, kind: input, shape index: {}]   ;;  %s1486_s4 = inlined_call_operand.vmem [shape: f32[128,1], index: 4, kind: input, shape index: {}]   ;;  %s1487_s5 = inlined_call_operand.vmem [shape: f32[128,1], index: 5, kind: input, shape index: {}]   ;;  %s1488_s6 = inlined_call_operand.<no memory space> [shape: f32[1], index: 6, kind: input, shape index: {}]   ;;  %s1489_s7 = inlined_call_operand.hbm [shape: f32[1,128], index: 7, kind: output, shape index: {}]  }
   0x1   :  { %v45_v0 = vld [vmem:[%s1482_s0] sm:$0xff]  ;;  %v46_v1 = vld [vmem:[%s1482_s0 + $0x8] sm:$0xff]  ;;  %v47_v2 = vld [vmem:[%s1482_s0 + $0x10] sm:$0xff]  ;;  %1073 = vset.pattern.permute.xlu0 %v1107_v6  ;;  %1074 = vset.pattern.permute.xlu1 %v1107_v6 }
   0x2   :  { %v1023_v3 = vpack.c.bf16 %v46_v1, %v45_v0  ;;  %vm1160_vm1 = vmpackc.low %vm157_vm0, %vm157_vm0  ;;  %v48_v5 = vld [vmem:[%s1482_s0 + $0x18] sm:$0xff]  ;;  %v61_v8 = vld [vmem:[%s1484_s2] sm:$0xff] }
   0x3   :  { %v1029_v7 = vpack.c.bf16 %v48_v5, %v47_v2  ;;  %v49_v9 = vld [vmem:[%s1482_s0 + $0x20] sm:$0xff]  ;;  %v50_v10 = vld [vmem:[%s1482_s0 + $0x28] sm:$0xff]  ;;  %79 = vperm.xlu0 %1073, %v61_v8   ;;  %v63_v11 = vld [vmem:[%s1484_s2 + $0x10] sm:$0xff] }
   0x4   :  { %1025 = vmatprep.subr.msk.bf16.mxu0 %vm1160_vm1, %v1023_v3  ;;  %89 = vperm.xlu1 %1074, %v63_v11   ;;  %v62_v12 = vld [vmem:[%s1484_s2 + $0x8] sm:$0xff]  ;;  %v29_v13 = vld [vmem:[%s1483_s1] sm:$0xff]  ;;  %v64_v14 = vld [vmem:[%s1484_s2 + $0x18] sm:$0xff]  ;;  %v1035_v15 = vpack.c.bf16 %v50_v10, %v49_v9 }
   0x5   :  { %1028 = vmatpush3.bf16.xpose.msk.msra.mxu0 %vm1160_vm1, %v1023_v3  ;;  %967 = vmatprep.mubr.msk.f32.mxu0 %vm157_vm0, %v29_v13  ;;  %v65_v16 = vld [vmem:[%s1484_s2 + $0x20] sm:$0xff]  ;;  %v66_v17 = vld [vmem:[%s1484_s2 + $0x28] sm:$0xff]  ;;  %v51_v18 = vld [vmem:[%s1482_s0 + $0x30] sm:$0xff] }
   0x6   :  { %1031 = vmatprep.subr.msk.bf16.mxu0 %vm1160_vm1, %v1029_v7  ;;  %v52_v19 = vld [vmem:[%s1482_s0 + $0x38] sm:$0xff]  ;;  %v67_v20 = vld [vmem:[%s1484_s2 + $0x30] sm:$0xff]  ;;  %v69_v23 = vld [vmem:[%s1484_s2 + $0x40] sm:$0xff] }
   0x7   :  { %84 = vperm.xlu0 %1073, %v62_v12   ;;  %v68_v21 = vld [vmem:[%s1484_s2 + $0x38] sm:$0xff]  ;;  %v1041_v22 = vpack.c.bf16 %v52_v19, %v51_v18  ;;  %v70_v24 = vld [vmem:[%s1484_s2 + $0x48] sm:$0xff]  ;;  %v53_v25 = vld [vmem:[%s1482_s0 + $0x40] sm:$0xff] }
   0x8   :  { %94 = vperm.xlu1 %1074, %v64_v14   ;;  %v54_v26 = vld [vmem:[%s1482_s0 + $0x48] sm:$0xff]  ;;  %v71_v27 = vld [vmem:[%s1484_s2 + $0x50] sm:$0xff]  ;;  %v72_v28 = vld [vmem:[%s1484_s2 + $0x58] sm:$0xff] }
   0x9   :  { %v1047_v29 = vpack.c.bf16 %v54_v26, %v53_v25  ;;  %v73_v30 = vld [vmem:[%s1484_s2 + $0x60] sm:$0xff]  ;;  %v74_v31 = vld [vmem:[%s1484_s2 + $0x68] sm:$0xff]  ;;  %v55_v32 = vld [vmem:[%s1482_s0 + $0x50] sm:$0xff] }
   0xa   :  { %v56_v33 = vld [vmem:[%s1482_s0 + $0x58] sm:$0xff]  ;;  %v75_v34 = vld [vmem:[%s1484_s2 + $0x70] sm:$0xff] }
   0xb   :  { %99 = vperm.xlu0 %1073, %v65_v16   ;;  %v76_v35 = vld [vmem:[%s1484_s2 + $0x78] sm:$0xff] }
   0xc   :  { %104 = vperm.xlu1 %1074, %v66_v17  }
   0xd   :  { %1034 = vmatpush3.bf16.xpose.msk.msra.mxu0 %vm1160_vm1, %v1029_v7 }
   0xe   :  { %1037 = vmatprep.subr.msk.bf16.mxu0 %vm1160_vm1, %v1035_v15 }
   0xf   :  { %109 = vperm.xlu0 %1073, %v67_v20  }
  0x10   :  { %114 = vperm.xlu1 %1074, %v68_v21  }
  0x13   :  { %119 = vperm.xlu0 %1073, %v69_v23  }
  0x14   :  { %124 = vperm.xlu1 %1074, %v70_v24  }
  0x15   :  { %1040 = vmatpush3.bf16.xpose.msk.msra.mxu0 %vm1160_vm1, %v1035_v15 }
  0x16   :  { %1043 = vmatprep.subr.msk.bf16.mxu0 %vm1160_vm1, %v1041_v22 }
  0x17   :  { %129 = vperm.xlu0 %1073, %v71_v27  }
  0x18   :  { %134 = vperm.xlu1 %1074, %v72_v28  }
  0x1b   :  { %139 = vperm.xlu0 %1073, %v73_v30  }
  0x1c   :  { %144 = vperm.xlu1 %1074, %v74_v31  }
  0x1d   :  { %1046 = vmatpush3.bf16.xpose.msk.msra.mxu0 %vm1160_vm1, %v1041_v22 }
  0x1e   :  { %1049 = vmatprep.subr.msk.bf16.mxu0 %vm1160_vm1, %v1047_v29 }
  0x1f   :  { %13 = vsyncpa [#allocation4], 0  ;;  %v1053_v36 = vpack.c.bf16 %v56_v33, %v55_v32  ;;  %149 = vperm.xlu0 %1073, %v75_v34   ;;  %v439_v37 = vld [vmem:[%s1486_s4] sm:$0xff]  ;;  %v440_v38 = vld [vmem:[%s1486_s4 + $0x8] sm:$0xff]  ;;  %s1108_s28 = smov [#allocation3]  }
  0x20   :  { %154 = vperm.xlu1 %1074, %v76_v35   ;;  %v57_v39 = vld [vmem:[%s1482_s0 + $0x60] sm:$0xff]  ;;  %v58_v40 = vld [vmem:[%s1482_s0 + $0x68] sm:$0xff]  ;;  %v441_v41 = vld [vmem:[%s1486_s4 + $0x10] sm:$0xff]  ;;  %s839_s29 = sshll.u32 %s1108_s28, 4  ;;  %s840_s29 = int_to_ptr.vmem [resolvable:$true] %s839_s29 }
  0x21   :  { %v442_v42 = vld [vmem:[%s1486_s4 + $0x18] sm:$0xff]  ;;  %v1059_v43 = vpack.c.bf16 %v58_v40, %v57_v39  ;;  %v696_v44 = vld [vmem:[%s1487_s5] sm:$0xff]  ;;  %v697_v45 = vld [vmem:[%s1487_s5 + $0x8] sm:$0xff]  ;;  %s1083_s30 = scalar_lea.vmem %s840_s29, 16  ;;  %s1087_s8 = scalar_lea.vmem %s840_s29, 32 }
  0x22   :  { %v59_v46 = vld [vmem:[%s1482_s0 + $0x70] sm:$0xff]  ;;  %v60_v47 = vld [vmem:[%s1482_s0 + $0x78] sm:$0xff]  ;;  %v443_v48 = vld [vmem:[%s1486_s4 + $0x20] sm:$0xff]  ;;  %p1084_p0 = scmp.ne.s32.totalorder %s840_s29, %s1083_s30  ;;  %p1088_p1 = scmp.lt.s32.totalorder %s840_s29, %s840_s29 }
  0x23   :  { %457 = vperm.xlu0 %1073, %v439_v37   ;;  %v698_v49 = vld [vmem:[%s1487_s5 + $0x10] sm:$0xff]  ;;  %v1065_v50 = vpack.c.bf16 %v60_v47, %v59_v46  ;;  %v444_v51 = vld [vmem:[%s1486_s4 + $0x28] sm:$0xff]  ;;  %v699_v52 = vld [vmem:[%s1487_s5 + $0x18] sm:$0xff]  ;;  %p1089_p2 = scmp.lt.s32.totalorder %s1087_s8, %s1083_s30 }
  0x24   :  { %462 = vperm.xlu1 %1074, %v440_v38   ;;  %v445_v53 = vld [vmem:[%s1486_s4 + $0x30] sm:$0xff]  ;;  %v700_v54 = vld [vmem:[%s1487_s5 + $0x20] sm:$0xff]  ;;  %v446_v55 = vld [vmem:[%s1486_s4 + $0x38] sm:$0xff] }
  0x25   :  { %1052 = vmatpush3.bf16.xpose.msk.msra.mxu0 %vm1160_vm1, %v1047_v29  ;;  %v701_v56 = vld [vmem:[%s1487_s5 + $0x28] sm:$0xff]  ;;  %v447_v57 = vld [vmem:[%s1486_s4 + $0x40] sm:$0xff]  ;;  %v702_v59 = vld [vmem:[%s1487_s5 + $0x30] sm:$0xff]  ;;  %p1090_p3 = por %p1089_p2, %p1088_p1 }
  0x26   :  { %1055 = vmatprep.subr.msk.bf16.mxu0 %vm1160_vm1, %v1053_v36  ;;  %v30_v58 = vld [vmem:[%s1483_s1 + $0x8] sm:$0xff]  ;;  %v31_v60 = vld [vmem:[%s1483_s1 + $0x10] sm:$0xff]  ;;  %v32_v62 = vld [vmem:[%s1483_s1 + $0x18] sm:$0xff] }
  0x27   :  { %467 = vperm.xlu0 %1073, %v441_v41   ;;  %v448_v61 = vld [vmem:[%s1486_s4 + $0x48] sm:$0xff]  ;;  %v703_v63 = vld [vmem:[%s1487_s5 + $0x38] sm:$0xff]  ;;  %v33_v0 = vld [vmem:[%s1483_s1 + $0x20] sm:$0xff]  ;;  %p1091_p4 = pnand %p1090_p3, %p1084_p0 }
  0x28   :  { %472 = vperm.xlu1 %1074, %v442_v42   ;;  %v449_v1 = vld [vmem:[%s1486_s4 + $0x50] sm:$0xff]  ;;  %v34_v2 = vld [vmem:[%s1483_s1 + $0x28] sm:$0xff]  ;;  %v704_v3 = vld [vmem:[%s1487_s5 + $0x40] sm:$0xff] }
  0x29   :  { %v35_v4 = vld [vmem:[%s1483_s1 + $0x30] sm:$0xff]  ;;  %v450_v5 = vld [vmem:[%s1486_s4 + $0x58] sm:$0xff]  ;;  %v705_v7 = vld [vmem:[%s1487_s5 + $0x48] sm:$0xff] }
  0x2a   :  { %v36_v6 = vld [vmem:[%s1483_s1 + $0x38] sm:$0xff]  ;;  %v37_v8 = vld [vmem:[%s1483_s1 + $0x40] sm:$0xff]  ;;  %v38_v10 = vld [vmem:[%s1483_s1 + $0x48] sm:$0xff] }
  0x2b   :  { %714 = vperm.xlu0 %1073, %v696_v44   ;;  %v451_v9 = vld [vmem:[%s1486_s4 + $0x60] sm:$0xff]  ;;  %v706_v11 = vld [vmem:[%s1487_s5 + $0x50] sm:$0xff]  ;;  %v452_v13 = vld [vmem:[%s1486_s4 + $0x68] sm:$0xff] }
  0x2c   :  { %719 = vperm.xlu1 %1074, %v697_v45   ;;  %v39_v12 = vld [vmem:[%s1483_s1 + $0x50] sm:$0xff]  ;;  %v40_v14 = vld [vmem:[%s1483_s1 + $0x58] sm:$0xff]  ;;  %v41_v16 = vld [vmem:[%s1483_s1 + $0x60] sm:$0xff] }
  0x2d   :  { %1058 = vmatpush3.bf16.xpose.msk.msra.mxu0 %vm1160_vm1, %v1053_v36  ;;  %v707_v15 = vld [vmem:[%s1487_s5 + $0x58] sm:$0xff]  ;;  %v453_v17 = vld [vmem:[%s1486_s4 + $0x70] sm:$0xff]  ;;  %v42_v18 = vld [vmem:[%s1483_s1 + $0x68] sm:$0xff] }
  0x2e   :  { %1061 = vmatprep.subr.msk.bf16.mxu0 %vm1160_vm1, %v1059_v43  ;;  %v708_v19 = vld [vmem:[%s1487_s5 + $0x60] sm:$0xff]  ;;  %v43_v20 = vld [vmem:[%s1483_s1 + $0x70] sm:$0xff]  ;;  %v454_v21 = vld [vmem:[%s1486_s4 + $0x78] sm:$0xff] }
  0x2f   :  { %477 = vperm.xlu0 %1073, %v443_v48   ;;  %v44_v22 = vld [vmem:[%s1483_s1 + $0x78] sm:$0xff]  ;;  %v709_v23 = vld [vmem:[%s1487_s5 + $0x68] sm:$0xff]  ;;  %v710_v24 = vld [vmem:[%s1487_s5 + $0x70] sm:$0xff] }
  0x30   :  { %724 = vperm.xlu1 %1074, %v698_v49   ;;  %v711_v25 = vld [vmem:[%s1487_s5 + $0x78] sm:$0xff]  ;;  %v1075_v26 = vld [vmem:[%s1485_s3] sm:$0xff]  }
  0x31   :  { %1007 = vmatprep.mubr.bf16.mxu1 %v1075_v26 }
  0x33   :  { %482 = vperm.xlu0 %1073, %v444_v51  }
  0x34   :  { %729 = vperm.xlu1 %1074, %v699_v52  }
  0x35   :  { %1064 = vmatpush3.bf16.xpose.msk.msra.mxu0 %vm1160_vm1, %v1059_v43 }
  0x36   :  { %1067 = vmatprep.subr.msk.bf16.mxu0 %vm1160_vm1, %v1065_v50 }
  0x37   :  { %487 = vperm.xlu0 %1073, %v445_v53  }
  0x38   :  { %734 = vperm.xlu1 %1074, %v700_v54  }
  0x3b   :  { %492 = vperm.xlu0 %1073, %v446_v55  }
  0x3c   :  { %739 = vperm.xlu1 %1074, %v701_v56  }
  0x3d   :  { %1070 = vmatpush3.bf16.xpose.msk.msra.mxu0 %vm1160_vm1, %v1065_v50 }
  0x3f   :  { %497 = vperm.xlu0 %1073, %v447_v57  }
  0x40   :  { %744 = vperm.xlu1 %1074, %v702_v59  }
  0x43   :  { %502 = vperm.xlu0 %1073, %v448_v61  }
  0x44   :  { %968 = vmatmul.mubr.msk.f32.vlgmr.msra.gmra.mrb[0].mxu0 %vm157_vm0, %v30_v58  ;;  %749 = vperm.xlu1 %1074, %v703_v63  }
  0x45   :  { %970 = vmatprep.mubr.msk.f32.mxu0 %vm157_vm0, %v31_v60 }
  0x47   :  { %507 = vperm.xlu0 %1073, %v449_v1  }
  0x48   :  { %971 = vmatmul.mubr.msk.f32.gmra.mrb[2].mxu0 %vm157_vm0, %v32_v62  ;;  %754 = vperm.xlu1 %1074, %v704_v3  }
  0x49   :  { %973 = vmatprep.mubr.msk.f32.mxu0 %vm157_vm0, %v33_v0 }
  0x4b   :  { %512 = vperm.xlu0 %1073, %v450_v5  }
  0x4c   :  { %974 = vmatmul.mubr.msk.f32.gmra.mrb[4].mxu0 %vm157_vm0, %v34_v2  ;;  %759 = vperm.xlu1 %1074, %v705_v7  }
  0x4d   :  { %976 = vmatprep.mubr.msk.f32.mxu0 %vm157_vm0, %v35_v4 }
  0x4f   :  { %517 = vperm.xlu0 %1073, %v451_v9  }
  0x50   :  { %977 = vmatmul.mubr.msk.f32.gmra.mrb[6].mxu0 %vm157_vm0, %v36_v6  ;;  %764 = vperm.xlu1 %1074, %v706_v11  }
  0x51   :  { %979 = vmatprep.mubr.msk.f32.mxu0 %vm157_vm0, %v37_v8 }
  0x53   :  { %522 = vperm.xlu0 %1073, %v452_v13  }
  0x54   :  { %980 = vmatmul.mubr.msk.f32.gmra.mrb[8].mxu0 %vm157_vm0, %v38_v10  ;;  %769 = vperm.xlu1 %1074, %v707_v15  }
  0x55   :  { %982 = vmatprep.mubr.msk.f32.mxu0 %vm157_vm0, %v39_v12 }
  0x57   :  { %527 = vperm.xlu0 %1073, %v453_v17  }
  0x58   :  { %983 = vmatmul.mubr.msk.f32.gmra.mrb[10].mxu0 %vm157_vm0, %v40_v14  ;;  %774 = vperm.xlu1 %1074, %v708_v19  }
  0x59   :  { %985 = vmatprep.mubr.msk.f32.mxu0 %vm157_vm0, %v41_v16 }
  0x5b   :  { %532 = vperm.xlu0 %1073, %v454_v21  }
  0x5c   :  { %986 = vmatmul.mubr.msk.f32.gmra.mrb[12].mxu0 %vm157_vm0, %v42_v18  ;;  %779 = vperm.xlu1 %1074, %v709_v23  }
  0x5d   :  { %988 = vmatprep.mubr.msk.f32.mxu0 %vm157_vm0, %v43_v20 }
  0x5f   :  { %784 = vperm.xlu0 %1073, %v710_v24  }
  0x60   :  { %989 = vmatmul.mubr.msk.f32.gmra.mrb[14].mxu0 %vm157_vm0, %v44_v22  ;;  %789 = vperm.xlu1 %1074, %v711_v25  }
  0x82   :  { %v80_v28 = vpop.permute.xlu0 %79 }
  0x83   :  { %v90_v27 = vpop.permute.xlu1 %89 }
  0x86   :  { %v85_v30 = vpop.permute.xlu0 %84 }
  0x87   :  { %v95_v29 = vpop.permute.xlu1 %94 }
  0x8a   :  { %v100_v32 = vpop.permute.xlu0 %99 }
  0x8b   :  { %v105_v31 = vpop.permute.xlu1 %104 }
  0x8e   :  { %v110_v41 = vpop.permute.xlu0 %109 }
  0x8f   :  { %v115_v38 = vpop.permute.xlu1 %114 }
  0x92   :  { %v120_v54 = vpop.permute.xlu0 %119 }
  0x93   :  { %v125_v51 = vpop.permute.xlu1 %124 }
  0x96   :  { %v130_v2 = vpop.permute.xlu0 %129 }
  0x97   :  { %v135_v63 = vpop.permute.xlu1 %134 }
  0x9a   :  { %v140_v15 = vpop.permute.xlu0 %139 }
  0x9b   :  { %v145_v12 = vpop.permute.xlu1 %144 }
  0x9f   :  { %v155_v24 = vpop.permute.xlu1 %154 }
 0x117   :  { %v969_v33 = vpop.f32.mrb[0].mxu0 }
 0x118   :  { %v326_v34 = vadd.f32 %v969_v33, %v85_v30  ;;  %v320_v35 = vpop.f32.mrb[1].mxu0 }
 0x119   :  { %v321_v36 = vadd.f32 %v320_v35, %v80_v28  ;;  %v1076_v35 = vld [vmem:[%s1485_s3 + $0x8] sm:$0xff]  }
 0x11a   :  { %v400_v37 = vmax.f32 %v326_v34, 0.0 }
 0x11b   :  { %v399_v39 = vmax.f32 %v321_v36, 0.0  ;;  %v972_v40 = vpop.f32.mrb[2].mxu0  ;;  %v1077_v36 = vld [vmem:[%s1485_s3 + $0x10] sm:$0xff]  }
 0x11c   :  { %v336_v42 = vadd.f32 %v972_v40, %v95_v29  ;;  %v330_v43 = vpop.f32.mrb[3].mxu0  ;;  %v1081_v40 = vld [vmem:[%s1485_s3 + $0x30] sm:$0xff]  }
 0x11d   :  { %v331_v44 = vadd.f32 %v330_v43, %v90_v27  ;;  %v431_v45 = vpack.c.bf16 %v400_v37, %v399_v39  ;;  %v150_v27 = vpop.permute.xlu0 %149  ;;  %v1078_v37 = vld [vmem:[%s1485_s3 + $0x18] sm:$0xff]   ;;  %v1080_v39 = vld [vmem:[%s1485_s3 + $0x28] sm:$0xff]   ;;  %v463_v43 = vpop.permute.xlu1 %462 }
 0x11e   :  { %v402_v46 = vmax.f32 %v336_v42, 0.0 }
 0x11f   :  { %v401_v47 = vmax.f32 %v331_v44, 0.0  ;;  %v975_v48 = vpop.f32.mrb[4].mxu0  ;;  %991 = vmatprep.subr.bf16.mxu1 %v431_v45 }
 0x120   :  { %v346_v49 = vadd.f32 %v975_v48, %v105_v31  ;;  %v340_v50 = vpop.f32.mrb[5].mxu0  ;;  %992 = vmatpush3.bf16.msra.mxu1 %v431_v45 }
 0x121   :  { %v432_v52 = vpack.c.bf16 %v402_v46, %v401_v47  ;;  %v341_v53 = vadd.f32 %v340_v50, %v100_v32  ;;  %v458_v42 = vpop.permute.xlu0 %457  ;;  %v473_v45 = vpop.permute.xlu1 %472 }
 0x122   :  { %v404_v55 = vmax.f32 %v346_v49, 0.0 }
 0x123   :  { %v403_v56 = vmax.f32 %v341_v53, 0.0  ;;  %v978_v57 = vpop.f32.mrb[6].mxu0  ;;  %993 = vmatprep.subr.bf16.mxu1 %v432_v52 }
 0x124   :  { %v356_v58 = vadd.f32 %v978_v57, %v115_v38  ;;  %v350_v59 = vpop.f32.mrb[7].mxu0  ;;  %994 = vmatpush3.bf16.msra.mxu1 %v432_v52  ;;  %v1079_v38 = vld [vmem:[%s1485_s3 + $0x20] sm:$0xff]  }
 0x125   :  { %v433_v60 = vpack.c.bf16 %v404_v55, %v403_v56  ;;  %v351_v61 = vadd.f32 %v350_v59, %v110_v41  ;;  %v1082_v41 = vld [vmem:[%s1485_s3 + $0x38] sm:$0xff]   ;;  %v468_v44 = vpop.permute.xlu0 %467  ;;  %v720_v47 = vpop.permute.xlu1 %719 }
 0x126   :  { %v406_v62 = vmax.f32 %v356_v58, 0.0 }
 0x127   :  { %v405_v0 = vmax.f32 %v351_v61, 0.0  ;;  %v981_v1 = vpop.f32.mrb[8].mxu0  ;;  %995 = vmatprep.subr.bf16.mxu1 %v433_v60 }
 0x128   :  { %v366_v3 = vadd.f32 %v981_v1, %v125_v51  ;;  %v360_v4 = vpop.f32.mrb[9].mxu0  ;;  %996 = vmatpush3.bf16.msra.mxu1 %v433_v60 }
 0x129   :  { %v434_v5 = vpack.c.bf16 %v406_v62, %v405_v0  ;;  %v361_v6 = vadd.f32 %v360_v4, %v120_v54  ;;  %v715_v46 = vpop.permute.xlu0 %714  ;;  %v725_v49 = vpop.permute.xlu1 %724 }
 0x12a   :  { %v408_v7 = vmax.f32 %v366_v3, 0.0 }
 0x12b   :  { %v407_v8 = vmax.f32 %v361_v6, 0.0  ;;  %v984_v9 = vpop.f32.mrb[10].mxu0  ;;  %997 = vmatprep.subr.bf16.mxu1 %v434_v5 }
 0x12c   :  { %v376_v10 = vadd.f32 %v984_v9, %v135_v63  ;;  %v370_v11 = vpop.f32.mrb[11].mxu0  ;;  %998 = vmatpush3.bf16.msra.mxu1 %v434_v5 }
 0x12d   :  { %v435_v13 = vpack.c.bf16 %v408_v7, %v407_v8  ;;  %v371_v14 = vadd.f32 %v370_v11, %v130_v2  ;;  %v478_v48 = vpop.permute.xlu0 %477  ;;  %v730_v51 = vpop.permute.xlu1 %729 }
 0x12e   :  { %v410_v16 = vmax.f32 %v376_v10, 0.0 }
 0x12f   :  { %v409_v17 = vmax.f32 %v371_v14, 0.0  ;;  %v987_v18 = vpop.f32.mrb[12].mxu0  ;;  %999 = vmatprep.subr.bf16.mxu1 %v435_v13 }
 0x130   :  { %v386_v19 = vadd.f32 %v987_v18, %v145_v12  ;;  %v380_v20 = vpop.f32.mrb[13].mxu0  ;;  %1000 = vmatpush3.bf16.msra.mxu1 %v435_v13 }
 0x131   :  { %v436_v21 = vpack.c.bf16 %v410_v16, %v409_v17  ;;  %v381_v22 = vadd.f32 %v380_v20, %v140_v15  ;;  %v483_v50 = vpop.permute.xlu0 %482  ;;  %v735_v53 = vpop.permute.xlu1 %734 }
 0x132   :  { %v412_v23 = vmax.f32 %v386_v19, 0.0 }
 0x133   :  { %v411_v25 = vmax.f32 %v381_v22, 0.0  ;;  %v990_v26 = vpop.f32.mrb[14].mxu0  ;;  %1001 = vmatprep.subr.bf16.mxu1 %v436_v21 }
 0x134   :  { %v396_v28 = vadd.f32 %v990_v26, %v155_v24  ;;  %v390_v29 = vpop.f32.mrb[15].mxu0  ;;  %1002 = vmatpush3.bf16.msra.mxu1 %v436_v21 }
 0x135   :  { %v437_v30 = vpack.c.bf16 %v412_v23, %v411_v25  ;;  %v391_v31 = vadd.f32 %v390_v29, %v150_v27  ;;  %v488_v52 = vpop.permute.xlu0 %487  ;;  %v740_v55 = vpop.permute.xlu1 %739 }
 0x136   :  { %v414_v32 = vmax.f32 %v396_v28, 0.0 }
 0x137   :  { %v413_v33 = vmax.f32 %v391_v31, 0.0  ;;  %1003 = vmatprep.subr.bf16.mxu1 %v437_v30 }
 0x138   :  { %1004 = vmatpush3.bf16.msra.mxu1 %v437_v30 }
 0x139   :  { %v438_v34 = vpack.c.bf16 %v414_v32, %v413_v33  ;;  %v493_v54 = vpop.permute.xlu0 %492  ;;  %v745_v57 = vpop.permute.xlu1 %744 }
 0x13b   :  { %1005 = vmatprep.subr.bf16.mxu1 %v438_v34 }
 0x13c   :  { %1006 = vmatpush3.bf16.msra.mxu1 %v438_v34 }
 0x13d   :  { %v498_v56 = vpop.permute.xlu0 %497  ;;  %v750_v59 = vpop.permute.xlu1 %749 }
 0x13f   :  { %1008 = vmatmul.mubr.bf16.vlgmr.msra.gmra.mrb[0].mxu1 %v1076_v35 }
 0x140   :  { %1011 = vmatprep.mubr.bf16.mxu1 %v1077_v36 }
 0x141   :  { %v503_v58 = vpop.permute.xlu0 %502  ;;  %v755_v61 = vpop.permute.xlu1 %754 }
 0x145   :  { %v508_v60 = vpop.permute.xlu0 %507  ;;  %v760_v8 = vpop.permute.xlu1 %759 }
 0x147   :  { %1012 = vmatmul.mubr.bf16.gmra.mrb[4].mxu1 %v1078_v37 }
 0x148   :  { %1015 = vmatprep.mubr.bf16.mxu1 %v1079_v38 }
 0x149   :  { %v513_v3 = vpop.permute.xlu0 %512  ;;  %v765_v22 = vpop.permute.xlu1 %764 }
 0x14d   :  { %v518_v15 = vpop.permute.xlu0 %517  ;;  %v770_v38 = vpop.permute.xlu1 %769 }
 0x14f   :  { %1016 = vmatmul.mubr.bf16.gmra.mrb[8].mxu1 %v1080_v39 }
 0x150   :  { %1019 = vmatprep.mubr.bf16.mxu1 %v1081_v40 }
 0x151   :  { %v523_v33 = vpop.permute.xlu0 %522 }
 0x157   :  { %1020 = vmatmul.mubr.bf16.gmra.mrb[12].mxu1 %v1082_v41 }
 0x212   :  { %v1009_v62 = vpop.f32.mrb[0].mxu1 }
 0x213   :  { %v617_v63 = vpop.f32.mrb[1].mxu1  ;;  %v626_v0 = vadd.f32 %v1009_v62, %v468_v44 }
 0x214   :  { %v618_v1 = vadd.f32 %v617_v63, %v458_v42  ;;  %v1010_v2 = vpop.f32.mrb[2].mxu1 }
 0x215   :  { %v629_v4 = vadd.f32 %v1010_v2, %v473_v45  ;;  %v620_v5 = vpop.f32.mrb[3].mxu1  ;;  %v682_v9 = vmax.f32 %v626_v0, 0.0 }
 0x216   :  { %v680_v6 = vmax.f32 %v618_v1, 0.0  ;;  %v621_v7 = vadd.f32 %v620_v5, %v463_v43 }
 0x217   :  { %v683_v11 = vmax.f32 %v629_v4, 0.0  ;;  %v794_v17 = vmul.f32 %v725_v49, %v682_v9 }
 0x218   :  { %v681_v10 = vmax.f32 %v621_v7, 0.0  ;;  %v792_v12 = vmul.f32 %v715_v46, %v680_v6 }
 0x219   :  { %v795_v23 = vmul.f32 %v730_v51, %v683_v11  ;;  %v528_v51 = vpop.permute.xlu0 %527 }
 0x21a   :  { %v793_v13 = vmul.f32 %v720_v47, %v681_v10  ;;  %v1013_v14 = vpop.f32.mrb[4].mxu1 }
 0x21b   :  { %v633_v16 = vpop.f32.mrb[5].mxu1  ;;  %v642_v19 = vadd.f32 %v1013_v14, %v488_v52 }
 0x21c   :  { %v808_v18 = vadd.f32 %v793_v13, %v792_v12  ;;  %v634_v20 = vadd.f32 %v633_v16, %v478_v48  ;;  %v1014_v21 = vpop.f32.mrb[6].mxu1 }
 0x21d   :  { %v636_v24 = vpop.f32.mrb[7].mxu1  ;;  %v645_v27 = vadd.f32 %v1014_v21, %v493_v54  ;;  %v686_v29 = vmax.f32 %v642_v19, 0.0 }
 0x21e   :  { %v809_v25 = vadd.f32 %v808_v18, %v794_v17  ;;  %v684_v26 = vmax.f32 %v634_v20, 0.0  ;;  %v637_v28 = vadd.f32 %v636_v24, %v483_v50 }
 0x21f   :  { %v687_v35 = vmax.f32 %v645_v27, 0.0  ;;  %v798_v40 = vmul.f32 %v745_v57, %v686_v29 }
 0x220   :  { %v796_v30 = vmul.f32 %v735_v53, %v684_v26  ;;  %v810_v31 = vadd.f32 %v809_v25, %v795_v23  ;;  %v685_v32 = vmax.f32 %v637_v28, 0.0 }
 0x221   :  { %v799_v47 = vmul.f32 %v750_v59, %v687_v35  ;;  %v533_v59 = vpop.permute.xlu0 %532 }
 0x222   :  { %v811_v34 = vadd.f32 %v810_v31, %v796_v30  ;;  %v797_v36 = vmul.f32 %v740_v55, %v685_v32  ;;  %v1017_v37 = vpop.f32.mrb[8].mxu1  ;;  %v775_v55 = vpop.permute.xlu1 %774  ;;  %v830_v30 = vstv %s1488_s6 }
 0x223   :  { %v649_v39 = vpop.f32.mrb[9].mxu1  ;;  %v658_v42 = vadd.f32 %v1017_v37, %v508_v60 }
 0x224   :  { %v812_v41 = vadd.f32 %v811_v34, %v797_v36  ;;  %v650_v43 = vadd.f32 %v649_v39, %v498_v56  ;;  %v1018_v44 = vpop.f32.mrb[10].mxu1 }
 0x225   :  { %v661_v45 = vadd.f32 %v1018_v44, %v513_v3  ;;  %v652_v46 = vpop.f32.mrb[11].mxu1  ;;  %v690_v52 = vmax.f32 %v658_v42, 0.0  ;;  %v785_v19 = vpop.permute.xlu0 %784 }
 0x226   :  { %v813_v48 = vadd.f32 %v812_v41, %v798_v40  ;;  %v688_v49 = vmax.f32 %v650_v43, 0.0  ;;  %v653_v50 = vadd.f32 %v652_v46, %v503_v58  ;;  %v780_v11 = vpop.permute.xlu1 %779 }
 0x227   :  { %v691_v63 = vmax.f32 %v661_v45, 0.0  ;;  %v802_v60 = vmul.f32 %v765_v22, %v690_v52 }
 0x228   :  { %v800_v53 = vmul.f32 %v755_v61, %v688_v49  ;;  %v814_v54 = vadd.f32 %v813_v48, %v799_v47  ;;  %v689_v62 = vmax.f32 %v653_v50, 0.0 }
 0x229   :  { %v803_v6 = vmul.f32 %v770_v38, %v691_v63 }
 0x22a   :  { %v815_v0 = vadd.f32 %v814_v54, %v800_v53  ;;  %v801_v1 = vmul.f32 %v760_v8, %v689_v62  ;;  %v1021_v57 = vpop.f32.mrb[12].mxu1 }
 0x22b   :  { %v665_v2 = vpop.f32.mrb[13].mxu1  ;;  %v674_v4 = vadd.f32 %v1021_v57, %v528_v51 }
 0x22c   :  { %v816_v56 = vadd.f32 %v815_v0, %v801_v1  ;;  %v666_v3 = vadd.f32 %v665_v2, %v518_v15  ;;  %v1022_v5 = vpop.f32.mrb[14].mxu1  ;;  %v790_v15 = vpop.permute.xlu1 %789 }
 0x22d   :  { %v668_v7 = vpop.f32.mrb[15].mxu1  ;;  %v677_v10 = vadd.f32 %v1022_v5, %v533_v59  ;;  %v694_v12 = vmax.f32 %v674_v4, 0.0 }
 0x22e   :  { %v817_v58 = vadd.f32 %v816_v56, %v802_v60  ;;  %v692_v9 = vmax.f32 %v666_v3, 0.0  ;;  %v669_v61 = vadd.f32 %v668_v7, %v523_v33 }
 0x22f   :  { %v695_v17 = vmax.f32 %v677_v10, 0.0  ;;  %v806_v20 = vmul.f32 %v785_v19, %v694_v12 }
 0x230   :  { %v804_v13 = vmul.f32 %v775_v55, %v692_v9  ;;  %v818_v14 = vadd.f32 %v817_v58, %v803_v6  ;;  %v693_v16 = vmax.f32 %v669_v61, 0.0 }
 0x231   :  { %v807_v22 = vmul.f32 %v790_v15, %v695_v17 }
 0x232   :  { %v819_v8 = vadd.f32 %v818_v14, %v804_v13  ;;  %v805_v18 = vmul.f32 %v780_v11, %v693_v16 }
 0x234   :  { %v820_v21 = vadd.f32 %v819_v8, %v805_v18 }
 0x236   :  { %v821_v23 = vadd.f32 %v820_v21, %v806_v20 }
 0x238   :  { %v822_v24 = vadd.f32 %v821_v23, %v807_v22 }
 0x23a   :  { %v823_v25 = vrot.slane %v822_v24, 4 }
 0x23c   :  { %v824_v26 = vadd.f32 %v823_v25, %v822_v24 }
 0x23e   :  { %v825_v27 = vrot.slane %v824_v26, 2 }
 0x240   :  { %v826_v28 = vadd.f32 %v825_v27, %v824_v26 }
 0x242   :  { %v827_v29 = vrot.slane %v826_v28, 1 }
 0x244   :  { %v828_v31 = vadd.f32 %v827_v29, %v826_v28 }
 0x246   :  { %v831_v32 = vadd.f32 %v830_v30, %v828_v31 }
 0x248   :  { %832 = vst [vmem:[#allocation3] sm:$0x1] %v831_v32 }
 0x249   :  { %1094 = shalt.err (!%p1091_p4)
}
 0x24a   :  { %s1095_s11 = scalar_lea.hbm %s1489_s7, 16 }
 0x24b   :  { %p1096_p5 = scmp.ne.s32.totalorder %s1489_s7, %s1095_s11  ;;  %p1099_p6 = scmp.lt.u32.totalorder %s1095_s11, %s1489_s7 }
 0x24d   :  { %p1101_p7 = pnand %p1099_p6, %p1096_p5 }
 0x24f   :  { %1104 = shalt.err (!%p1101_p7)
}
 0x250   :  { %842 = dma.vmem_to_hbm [thread:$0]  %s840_s29, 16, %s1489_s7, [#allocation4]  }
 0x251   :  { %1105 = dma.done.wait [#allocation4], 16  }
 0x252   :  { %1106 = vsyncadd [#allocation4], 4294967280 }
 0x253   :  { %846 = vsyncpa [#allocation4], 1 }

</bundles_post_ra>
